<compile_context>
chip_gen: v7x
topology: tpu7x:2x2x1
jax: 0.10.0
libtpu: 0.0.40
codegen_flags: <defaults>
</compile_context>

<pallas_src>
import functools

import jax
import jax.numpy as jnp
from jax.experimental import pallas as pl
from jax.experimental.pallas import tpu as pltpu


def _round_up(n: int, m: int) -> int:
    return (n + m - 1) // m * m


# ------------------------------- fused kernel -------------------------------

def _fused_base_head_kernel(x_ref, w1_ref, b1_ref, w2_ref, b2_ref,
                            w3_ref, b3_ref, out_ref, h1_ref, *, mxu_dtype):
    """Whole base+head chain on one batch tile; intermediates stay in vregs/VMEM.

    x_ref  : [TM, KP]  (mxu_dtype)        w1 : [KP, HP]   b1 : [1, HP] (f32)
    out_ref: [TM, CP]  (f32)              w2 : [HP, FP]   b2 : [1, FP] (f32)
    h1_ref : [TM, HP]  (bf16)             w3 : [FP, CP]   b3 : [1, CP] (f32)
    """
    x = x_ref[...]
    # --- base layer 1: bf16 MXU matmul, f32 accumulate + f32 bias/relu epilogue ---
    h1 = jnp.dot(x, w1_ref[...], preferred_element_type=jnp.float32)
    h1 = jnp.maximum(h1 + b1_ref[...], 0.0)                       # [TM, HP] f32
    h1_ref[...] = h1.astype(h1_ref.dtype)                         # bf16 store (2nd output)
    # --- base layer 2 ---
    f = jnp.dot(h1.astype(mxu_dtype), w2_ref[...],
                preferred_element_type=jnp.float32)
    f = jnp.maximum(f + b2_ref[...], 0.0)                         # [TM, FP] f32
    # --- head (linear, no activation) ---
    y = jnp.dot(f.astype(mxu_dtype), w3_ref[...],
                preferred_element_type=jnp.float32)
    out_ref[...] = (y + b3_ref[...]).astype(out_ref.dtype)        # [TM, CP] f32


# ------------------------------ parameter setup -----------------------------

def init_params(key, in_dim, hidden_dim, feat_dim, num_classes, dtype=jnp.float32):
    k1, k2, k3 = jax.random.split(key, 3)
    return {
        "base": {
            "w1": jax.random.normal(k1, (in_dim, hidden_dim), dtype) / jnp.sqrt(in_dim),
            "b1": jnp.zeros((hidden_dim,), dtype),
            "w2": jax.random.normal(k2, (hidden_dim, feat_dim), dtype) / jnp.sqrt(hidden_dim),
            "b2": jnp.zeros((feat_dim,), dtype),
        },
        "head": {
            "w3": jax.random.normal(k3, (feat_dim, num_classes), dtype) / jnp.sqrt(feat_dim),
            "b3": jnp.zeros((num_classes,), dtype),
        },
    }


def prepare_params(params, *, mxu_dtype=jnp.bfloat16):
    """One-time hoist: zero-pad dims and cast MXU operands.

    Contraction dim K is padded only to a sublane multiple (16 for bf16); the lane dims of
    the stored outputs (H, F, C) are padded to 128 so every vst is lane-dense / unmasked.
    Zero padding keeps the math exact.
    """
    w1, b1 = params["base"]["w1"], params["base"]["b1"]
    w2, b2 = params["base"]["w2"], params["base"]["b2"]
    w3, b3 = params["head"]["w3"], params["head"]["b3"]
    K, H = w1.shape
    _, F = w2.shape
    _, C = w3.shape
    KP = _round_up(K, 16)                       # sublane pack only (review: no 128 pad on K)
    HP, FP, CP = (_round_up(d, 128) for d in (H, F, C))

    def pad_w(w, rp, cp):
        w = w.astype(mxu_dtype)
        return jnp.pad(w, ((0, rp - w.shape[0]), (0, cp - w.shape[1])))

    def pad_b(b, cp):
        b = b.astype(jnp.float32).reshape(1, -1)
        return jnp.pad(b, ((0, 0), (0, cp - b.shape[1])))

    return {
        "mxu_dtype": mxu_dtype,
        "in_dim": K, "hidden_dim": H, "feat_dim": F, "n_classes": C,
        "w1": pad_w(w1, KP, HP), "b1": pad_b(b1, HP),
        "w2": pad_w(w2, HP, FP), "b2": pad_b(b2, FP),
        "w3": pad_w(w3, FP, CP), "b3": pad_b(b3, CP),
    }


# ----------------------------- chip-aware tiling -----------------------------

def _tile_defaults():
    """(default batch tile, two-TensorCore hint) from the attached TPU generation."""
    kind = ""
    try:
        kind = jax.devices()[0].device_kind.lower()
    except Exception:  # no device info -> conservative defaults
        pass
    older = any(tag in kind for tag in ("v2", "v3", "v4", "v5"))
    tm = 128 if older else 256          # v5e: 128-wide MXU / 1 vst slot; v6e/v7x: 256x256 MXU
    two_cores = "v7" in kind            # v7x has 2 TensorCores per chip
    return tm, two_cores


# --------------------------------- forward ----------------------------------

def base_head_split_forward(prep, x, *, tm=None):
    """Mirrors BaseHeadSplit.forward: out, x = base(x); out = head(out); return (out, x)."""
    B, K = x.shape
    mxu_dtype = prep["mxu_dtype"]
    KP, HP = prep["w1"].shape
    _, FP = prep["w2"].shape
    _, CP = prep["w3"].shape
    assert K == prep["in_dim"]

    tm_default, two_cores = _tile_defaults()
    if tm is None:
        tm = tm_default

    # Batch tiling: TM a multiple of 16 (bf16 sublane pack).  On 2-TC chips make sure a
    # mid-size batch still produces >=2 grid steps so "parallel" splits across both cores.
    BP = _round_up(max(B, 16), 16)
    if BP > tm:
        TM = tm
    elif two_cores and BP >= 32:
        TM = _round_up(pl.cdiv(BP, 2), 16)
    else:
        TM = BP
    BP = _round_up(BP, TM)
    grid = (BP // TM,)

    # Single fused cast+pad (no zeros + dynamic_update_slice round trip through HBM).
    xp = x.astype(mxu_dtype)
    if BP != B or KP != K:
        xp = jnp.pad(xp, ((0, BP - B), (0, KP - K)))

    # --- VMEM budget: weights resident (x2 headroom), grid blocks double-buffered,
    #     f32 intermediates; floored at the default 32 MiB, capped at v7x's 64 MiB. ---
    mxu_bytes = jnp.dtype(mxu_dtype).itemsize
    w_bytes = sum(int(prep[k].size) * prep[k].dtype.itemsize
                  for k in ("w1", "b1", "w2", "b2", "w3", "b3"))
    io_bytes = 2 * (TM * KP * mxu_bytes + TM * CP * 4 + TM * HP * 2)
    scratch_bytes = TM * (HP + FP + CP) * 4
    vmem_limit = int(min(64 << 20,
                         max(32 << 20, 2 * w_bytes + io_bytes + scratch_bytes + (2 << 20))))

    H, F, C = prep["hidden_dim"], prep["feat_dim"], prep["n_classes"]
    cost = pl.CostEstimate(
        flops=2 * B * (K * H + H * F + F * C),
        transcendentals=0,
        bytes_accessed=int(B * K * x.dtype.itemsize + w_bytes + B * C * 4 + B * H * 2),
    )

    kernel = functools.partial(_fused_base_head_kernel, mxu_dtype=mxu_dtype)
    out_shape = (
        jax.ShapeDtypeStruct((BP, CP), jnp.float32),     # head output (small, f32)
        jax.ShapeDtypeStruct((BP, HP), jnp.bfloat16),    # h1: bf16 -> half the HBM writeback
    )
    out_specs = (
        pl.BlockSpec((TM, CP), lambda i: (i, 0)),
        pl.BlockSpec((TM, HP), lambda i: (i, 0)),
    )
    w_shapes = [(KP, HP), (1, HP), (HP, FP), (1, FP), (FP, CP), (1, CP)]
    const_map = lambda i: (0, 0)

    def _run(single_buffer_weights):
        if single_buffer_weights:
            # Constant-index weights don't need a second pipeline buffer.
            w_specs = [pl.BlockSpec(s, const_map, pipeline_mode=pl.Buffered(1))
                       for s in w_shapes]
        else:
            w_specs = [pl.BlockSpec(s, const_map) for s in w_shapes]
        res = pl.pallas_call(
            kernel,
            out_shape=out_shape,
            grid=grid,
            in_specs=[pl.BlockSpec((TM, KP), lambda i: (i, 0))] + w_specs,
            out_specs=out_specs,
            compiler_params=pltpu.CompilerParams(
                dimension_semantics=("parallel",),       # batch axis -> both TCs on v7x
                vmem_limit_bytes=vmem_limit),
            cost_estimate=cost,
        )(xp, prep["w1"], prep["b1"], prep["w2"], prep["b2"], prep["w3"], prep["b3"])
        return jax.block_until_ready(res)

    try:
        out_p, h1_p = _run(True)
    except Exception:
        # Some JAX versions reject pipeline_mode on pallas_call inputs; fall back to the
        # default double-buffered weights (correctness identical, slightly more VMEM).
        out_p, h1_p = _run(False)

    # Strip padding in the wrapper (kernel-side outputs stay 128-lane dense).
    return out_p[:B, :C], h1_p[:B, :H]


# -------------------------------- reference ---------------------------------

def _reference(params, x, mxu_dtype):
    w1 = params["base"]["w1"].astype(mxu_dtype)
    w2 = params["base"]["w2"].astype(mxu_dtype)
    w3 = params["head"]["w3"].astype(mxu_dtype)
    b1, b2, b3 = params["base"]["b1"], params["base"]["b2"], params["head"]["b3"]
    h1 = jnp.maximum(
        jnp.dot(x.astype(mxu_dtype), w1, preferred_element_type=jnp.float32) + b1, 0.0)
    f = jnp.maximum(
        jnp.dot(h1.astype(mxu_dtype), w2, preferred_element_type=jnp.float32) + b2, 0.0)
    out = jnp.dot(f.astype(mxu_dtype), w3, preferred_element_type=jnp.float32) + b3
    return out, h1


if __name__ == "__main__":
    B, IN, HID, FEAT, NCLS = 8, 32, 64, 64, 16

    key = jax.random.PRNGKey(0)
    kx, kp = jax.random.split(key)
    x = jax.random.normal(kx, (B, IN), jnp.float32)
    params = init_params(kp, IN, HID, FEAT, NCLS)

    prep = prepare_params(params, mxu_dtype=jnp.bfloat16)
    out, feats = base_head_split_forward(prep, x)
    jax.block_until_ready((out, feats))

    assert out.shape == (B, NCLS) and feats.shape == (B, HID)

    # Reference with matching bf16 MXU operands + f32 accumulation/epilogue.
    out_ref, h1_ref = _reference(params, x, jnp.bfloat16)
    assert jnp.allclose(out, out_ref, atol=2e-2, rtol=2e-2)
    assert jnp.allclose(feats.astype(jnp.float32), h1_ref, atol=2e-2, rtol=2e-2)

    print("KERNEL_OK")
</pallas_src>

<mosaic_0001>
module attributes {stable_mosaic.version = 11 : i64} {
  func.func @_fused_base_head_kernel(%arg0: i32, %arg1: memref<16x32xbf16, #tpu.memory_space<vmem>>, %arg2: memref<32x128xbf16, #tpu.memory_space<vmem>>, %arg3: memref<1x128xf32, #tpu.memory_space<vmem>>, %arg4: memref<128x128xbf16, #tpu.memory_space<vmem>>, %arg5: memref<1x128xf32, #tpu.memory_space<vmem>>, %arg6: memref<128x128xbf16, #tpu.memory_space<vmem>>, %arg7: memref<1x128xf32, #tpu.memory_space<vmem>>, %arg8: memref<16x128xf32, #tpu.memory_space<vmem>>, %arg9: memref<16x128xbf16, #tpu.memory_space<vmem>>) attributes {dimension_semantics = [#tpu.dimension_semantics<parallel>], iteration_bounds = array<i64: 1>, scalar_prefetch = 0 : i64, scratch_operands = 0 : i64, tpu.core_type = #tpu.core_type<tc>, window_params = [{transform_indices = @transform_0, window_bounds = array<i64: 16, 32>}, {pipeline_mode = #tpu.pipeline_mode<synchronous>, transform_indices = @transform_1, window_bounds = array<i64: 32, 128>}, {pipeline_mode = #tpu.pipeline_mode<synchronous>, transform_indices = @transform_2, window_bounds = array<i64: 1, 128>}, {pipeline_mode = #tpu.pipeline_mode<synchronous>, transform_indices = @transform_3, window_bounds = array<i64: 128, 128>}, {pipeline_mode = #tpu.pipeline_mode<synchronous>, transform_indices = @transform_4, window_bounds = array<i64: 1, 128>}, {pipeline_mode = #tpu.pipeline_mode<synchronous>, transform_indices = @transform_5, window_bounds = array<i64: 128, 128>}, {pipeline_mode = #tpu.pipeline_mode<synchronous>, transform_indices = @transform_6, window_bounds = array<i64: 1, 128>}, {transform_indices = @transform_7, window_bounds = array<i64: 16, 128>}, {transform_indices = @transform_8, window_bounds = array<i64: 16, 128>}]} {
    %c0 = arith.constant 0 : index
    %c0_0 = arith.constant 0 : index
    %0 = vector.load %arg1[%c0, %c0_0] : memref<16x32xbf16, #tpu.memory_space<vmem>>, vector<16x32xbf16>
    %c0_1 = arith.constant 0 : index
    %c0_2 = arith.constant 0 : index
    %1 = vector.load %arg2[%c0_1, %c0_2] : memref<32x128xbf16, #tpu.memory_space<vmem>>, vector<32x128xbf16>
    %cst = arith.constant dense<0.000000e+00> : vector<16x128xf32>
    %2 = tpu.matmul %0, %1, %cst {dimension_numbers = #tpu.dot_dimension_numbers<[1], [0], [0], [1], [0, 0, 1, 1], [], []>} : vector<16x32xbf16>, vector<32x128xbf16>, vector<16x128xf32> -> vector<16x128xf32>
    %c0_3 = arith.constant 0 : index
    %c0_4 = arith.constant 0 : index
    %3 = vector.load %arg3[%c0_3, %c0_4] : memref<1x128xf32, #tpu.memory_space<vmem>>, vector<1x128xf32>
    %4 = vector.broadcast %3 : vector<1x128xf32> to vector<16x128xf32>
    %5 = arith.addf %2, %4 : vector<16x128xf32>
    %cst_5 = arith.constant 0.000000e+00 : f32
    %6 = vector.broadcast %cst_5 : f32 to vector<16x128xf32>
    %7 = arith.maximumf %5, %6 : vector<16x128xf32>
    %8 = arith.truncf %7 : vector<16x128xf32> to vector<16x128xbf16>
    %c0_6 = arith.constant 0 : index
    %c0_7 = arith.constant 0 : index
    %9 = vector.load %arg9[%c0_6, %c0_7] : memref<16x128xbf16, #tpu.memory_space<vmem>>, vector<16x128xbf16>
    tpu.vector_store %arg9[%c0_6, %c0_7], %8 {strides = array<i32>} : memref<16x128xbf16, #tpu.memory_space<vmem>>, vector<16x128xbf16>,
    %10 = arith.truncf %7 : vector<16x128xf32> to vector<16x128xbf16>
    %c0_8 = arith.constant 0 : index
    %c0_9 = arith.constant 0 : index
    %11 = vector.load %arg4[%c0_8, %c0_9] : memref<128x128xbf16, #tpu.memory_space<vmem>>, vector<128x128xbf16>
    %cst_10 = arith.constant dense<0.000000e+00> : vector<16x128xf32>
    %12 = tpu.matmul %10, %11, %cst_10 {dimension_numbers = #tpu.dot_dimension_numbers<[1], [0], [0], [1], [0, 0, 1, 1], [], []>} : vector<16x128xbf16>, vector<128x128xbf16>, vector<16x128xf32> -> vector<16x128xf32>
    %c0_11 = arith.constant 0 : index
    %c0_12 = arith.constant 0 : index
    %13 = vector.load %arg5[%c0_11, %c0_12] : memref<1x128xf32, #tpu.memory_space<vmem>>, vector<1x128xf32>
    %14 = vector.broadcast %13 : vector<1x128xf32> to vector<16x128xf32>
    %15 = arith.addf %12, %14 : vector<16x128xf32>
    %cst_13 = arith.constant 0.000000e+00 : f32
    %16 = vector.broadcast %cst_13 : f32 to vector<16x128xf32>
    %17 = arith.maximumf %15, %16 : vector<16x128xf32>
    %18 = arith.truncf %17 : vector<16x128xf32> to vector<16x128xbf16>
    %c0_14 = arith.constant 0 : index
    %c0_15 = arith.constant 0 : index
    %19 = vector.load %arg6[%c0_14, %c0_15] : memref<128x128xbf16, #tpu.memory_space<vmem>>, vector<128x128xbf16>
    %cst_16 = arith.constant dense<0.000000e+00> : vector<16x128xf32>
    %20 = tpu.matmul %18, %19, %cst_16 {dimension_numbers = #tpu.dot_dimension_numbers<[1], [0], [0], [1], [0, 0, 1, 1], [], []>} : vector<16x128xbf16>, vector<128x128xbf16>, vector<16x128xf32> -> vector<16x128xf32>
    %c0_17 = arith.constant 0 : index
    %c0_18 = arith.constant 0 : index
    %21 = vector.load %arg7[%c0_17, %c0_18] : memref<1x128xf32, #tpu.memory_space<vmem>>, vector<1x128xf32>
    %22 = vector.broadcast %21 : vector<1x128xf32> to vector<16x128xf32>
    %23 = arith.addf %20, %22 : vector<16x128xf32>
    %c0_19 = arith.constant 0 : index
    %c0_20 = arith.constant 0 : index
    %24 = vector.load %arg8[%c0_19, %c0_20] : memref<16x128xf32, #tpu.memory_space<vmem>>, vector<16x128xf32>
    tpu.vector_store %arg8[%c0_19, %c0_20], %23 {strides = array<i32>} : memref<16x128xf32, #tpu.memory_space<vmem>>, vector<16x128xf32>,
    return
  }
  func.func @transform_0(%arg0: i32) -> (i32, i32) {
    %c0_i32 = arith.constant 0 : i32
    %c0_i32_0 = arith.constant 0 : i32
    return %arg0, %c0_i32 : i32, i32
  }
  func.func @transform_1(%arg0: i32) -> (i32, i32) {
    %c0_i32 = arith.constant 0 : i32
    %c0_i32_0 = arith.constant 0 : i32
    %c0_i32_1 = arith.constant 0 : i32
    return %c0_i32, %c0_i32_0 : i32, i32
  }
  func.func @transform_2(%arg0: i32) -> (i32, i32) {
    %c0_i32 = arith.constant 0 : i32
    %c0_i32_0 = arith.constant 0 : i32
    %c0_i32_1 = arith.constant 0 : i32
    return %c0_i32, %c0_i32_0 : i32, i32
  }
  func.func @transform_3(%arg0: i32) -> (i32, i32) {
    %c0_i32 = arith.constant 0 : i32
    %c0_i32_0 = arith.constant 0 : i32
    %c0_i32_1 = arith.constant 0 : i32
    return %c0_i32, %c0_i32_0 : i32, i32
  }
  func.func @transform_4(%arg0: i32) -> (i32, i32) {
    %c0_i32 = arith.constant 0 : i32
    %c0_i32_0 = arith.constant 0 : i32
    %c0_i32_1 = arith.constant 0 : i32
    return %c0_i32, %c0_i32_0 : i32, i32
  }
  func.func @transform_5(%arg0: i32) -> (i32, i32) {
    %c0_i32 = arith.constant 0 : i32
    %c0_i32_0 = arith.constant 0 : i32
    %c0_i32_1 = arith.constant 0 : i32
    return %c0_i32, %c0_i32_0 : i32, i32
  }
  func.func @transform_6(%arg0: i32) -> (i32, i32) {
    %c0_i32 = arith.constant 0 : i32
    %c0_i32_0 = arith.constant 0 : i32
    %c0_i32_1 = arith.constant 0 : i32
    return %c0_i32, %c0_i32_0 : i32, i32
  }
  func.func @transform_7(%arg0: i32) -> (i32, i32) {
    %c0_i32 = arith.constant 0 : i32
    %c0_i32_0 = arith.constant 0 : i32
    return %arg0, %c0_i32 : i32, i32
  }
  func.func @transform_8(%arg0: i32) -> (i32, i32) {
    %c0_i32 = arith.constant 0 : i32
    %c0_i32_0 = arith.constant 0 : i32
    return %arg0, %c0_i32 : i32, i32
  }
}

module attributes {stable_mosaic.version = 11 : i64} {
  func.func @_fused_base_head_kernel(%arg0: i32, %arg1: memref<16x32xbf16, #tpu.memory_space<vmem>>, %arg2: memref<32x128xbf16, #tpu.memory_space<vmem>>, %arg3: memref<1x128xf32, #tpu.memory_space<vmem>>, %arg4: memref<128x128xbf16, #tpu.memory_space<vmem>>, %arg5: memref<1x128xf32, #tpu.memory_space<vmem>>, %arg6: memref<128x128xbf16, #tpu.memory_space<vmem>>, %arg7: memref<1x128xf32, #tpu.memory_space<vmem>>, %arg8: memref<16x128xf32, #tpu.memory_space<vmem>>, %arg9: memref<16x128xbf16, #tpu.memory_space<vmem>>) attributes {dimension_semantics = [#tpu.dimension_semantics<parallel>], iteration_bounds = array<i64: 1>, scalar_prefetch = 0 : i64, scratch_operands = 0 : i64, tpu.core_type = #tpu.core_type<tc>, window_params = [{transform_indices = @transform_0, window_bounds = array<i64: 16, 32>}, {pipeline_mode = #tpu.pipeline_mode<synchronous>, transform_indices = @transform_1, window_bounds = array<i64: 32, 128>}, {pipeline_mode = #tpu.pipeline_mode<synchronous>, transform_indices = @transform_2, window_bounds = array<i64: 1, 128>}, {pipeline_mode = #tpu.pipeline_mode<synchronous>, transform_indices = @transform_3, window_bounds = array<i64: 128, 128>}, {pipeline_mode = #tpu.pipeline_mode<synchronous>, transform_indices = @transform_4, window_bounds = array<i64: 1, 128>}, {pipeline_mode = #tpu.pipeline_mode<synchronous>, transform_indices = @transform_5, window_bounds = array<i64: 128, 128>}, {pipeline_mode = #tpu.pipeline_mode<synchronous>, transform_indices = @transform_6, window_bounds = array<i64: 1, 128>}, {transform_indices = @transform_7, window_bounds = array<i64: 16, 128>}, {transform_indices = @transform_8, window_bounds = array<i64: 16, 128>}]} {
    %c0 = arith.constant 0 : index
    %c0_0 = arith.constant 0 : index
    %0 = vector.load %arg1[%c0, %c0_0] : memref<16x32xbf16, #tpu.memory_space<vmem>>, vector<16x32xbf16>
    %c0_1 = arith.constant 0 : index
    %c0_2 = arith.constant 0 : index
    %1 = vector.load %arg2[%c0_1, %c0_2] : memref<32x128xbf16, #tpu.memory_space<vmem>>, vector<32x128xbf16>
    %cst = arith.constant dense<0.000000e+00> : vector<16x128xf32>
    %2 = tpu.matmul %0, %1, %cst {dimension_numbers = #tpu.dot_dimension_numbers<[1], [0], [0], [1], [0, 0, 1, 1], [], []>} : vector<16x32xbf16>, vector<32x128xbf16>, vector<16x128xf32> -> vector<16x128xf32>
    %c0_3 = arith.constant 0 : index
    %c0_4 = arith.constant 0 : index
    %3 = vector.load %arg3[%c0_3, %c0_4] : memref<1x128xf32, #tpu.memory_space<vmem>>, vector<1x128xf32>
    %4 = vector.broadcast %3 : vector<1x128xf32> to vector<16x128xf32>
    %5 = arith.addf %2, %4 : vector<16x128xf32>
    %cst_5 = arith.constant 0.000000e+00 : f32
    %6 = vector.broadcast %cst_5 : f32 to vector<16x128xf32>
    %7 = arith.maximumf %5, %6 : vector<16x128xf32>
    %8 = arith.truncf %7 : vector<16x128xf32> to vector<16x128xbf16>
    %c0_6 = arith.constant 0 : index
    %c0_7 = arith.constant 0 : index
    %9 = vector.load %arg9[%c0_6, %c0_7] : memref<16x128xbf16, #tpu.memory_space<vmem>>, vector<16x128xbf16>
    tpu.vector_store %arg9[%c0_6, %c0_7], %8 {strides = array<i32>} : memref<16x128xbf16, #tpu.memory_space<vmem>>, vector<16x128xbf16>,
    %10 = arith.truncf %7 : vector<16x128xf32> to vector<16x128xbf16>
    %c0_8 = arith.constant 0 : index
    %c0_9 = arith.constant 0 : index
    %11 = vector.load %arg4[%c0_8, %c0_9] : memref<128x128xbf16, #tpu.memory_space<vmem>>, vector<128x128xbf16>
    %cst_10 = arith.constant dense<0.000000e+00> : vector<16x128xf32>
    %12 = tpu.matmul %10, %11, %cst_10 {dimension_numbers = #tpu.dot_dimension_numbers<[1], [0], [0], [1], [0, 0, 1, 1], [], []>} : vector<16x128xbf16>, vector<128x128xbf16>, vector<16x128xf32> -> vector<16x128xf32>
    %c0_11 = arith.constant 0 : index
    %c0_12 = arith.constant 0 : index
    %13 = vector.load %arg5[%c0_11, %c0_12] : memref<1x128xf32, #tpu.memory_space<vmem>>, vector<1x128xf32>
    %14 = vector.broadcast %13 : vector<1x128xf32> to vector<16x128xf32>
    %15 = arith.addf %12, %14 : vector<16x128xf32>
    %cst_13 = arith.constant 0.000000e+00 : f32
    %16 = vector.broadcast %cst_13 : f32 to vector<16x128xf32>
    %17 = arith.maximumf %15, %16 : vector<16x128xf32>
    %18 = arith.truncf %17 : vector<16x128xf32> to vector<16x128xbf16>
    %c0_14 = arith.constant 0 : index
    %c0_15 = arith.constant 0 : index
    %19 = vector.load %arg6[%c0_14, %c0_15] : memref<128x128xbf16, #tpu.memory_space<vmem>>, vector<128x128xbf16>
    %cst_16 = arith.constant dense<0.000000e+00> : vector<16x128xf32>
    %20 = tpu.matmul %18, %19, %cst_16 {dimension_numbers = #tpu.dot_dimension_numbers<[1], [0], [0], [1], [0, 0, 1, 1], [], []>} : vector<16x128xbf16>, vector<128x128xbf16>, vector<16x128xf32> -> vector<16x128xf32>
    %c0_17 = arith.constant 0 : index
    %c0_18 = arith.constant 0 : index
    %21 = vector.load %arg7[%c0_17, %c0_18] : memref<1x128xf32, #tpu.memory_space<vmem>>, vector<1x128xf32>
    %22 = vector.broadcast %21 : vector<1x128xf32> to vector<16x128xf32>
    %23 = arith.addf %20, %22 : vector<16x128xf32>
    %c0_19 = arith.constant 0 : index
    %c0_20 = arith.constant 0 : index
    %24 = vector.load %arg8[%c0_19, %c0_20] : memref<16x128xf32, #tpu.memory_space<vmem>>, vector<16x128xf32>
    tpu.vector_store %arg8[%c0_19, %c0_20], %23 {strides = array<i32>} : memref<16x128xf32, #tpu.memory_space<vmem>>, vector<16x128xf32>,
    return
  }
  func.func @transform_0(%arg0: i32) -> (i32, i32) {
    %c0_i32 = arith.constant 0 : i32
    %c0_i32_0 = arith.constant 0 : i32
    return %arg0, %c0_i32 : i32, i32
  }
  func.func @transform_1(%arg0: i32) -> (i32, i32) {
    %c0_i32 = arith.constant 0 : i32
    %c0_i32_0 = arith.constant 0 : i32
    %c0_i32_1 = arith.constant 0 : i32
    return %c0_i32, %c0_i32_0 : i32, i32
  }
  func.func @transform_2(%arg0: i32) -> (i32, i32) {
    %c0_i32 = arith.constant 0 : i32
    %c0_i32_0 = arith.constant 0 : i32
    %c0_i32_1 = arith.constant 0 : i32
    return %c0_i32, %c0_i32_0 : i32, i32
  }
  func.func @transform_3(%arg0: i32) -> (i32, i32) {
    %c0_i32 = arith.constant 0 : i32
    %c0_i32_0 = arith.constant 0 : i32
    %c0_i32_1 = arith.constant 0 : i32
    return %c0_i32, %c0_i32_0 : i32, i32
  }
  func.func @transform_4(%arg0: i32) -> (i32, i32) {
    %c0_i32 = arith.constant 0 : i32
    %c0_i32_0 = arith.constant 0 : i32
    %c0_i32_1 = arith.constant 0 : i32
    return %c0_i32, %c0_i32_0 : i32, i32
  }
  func.func @transform_5(%arg0: i32) -> (i32, i32) {
    %c0_i32 = arith.constant 0 : i32
    %c0_i32_0 = arith.constant 0 : i32
    %c0_i32_1 = arith.constant 0 : i32
    return %c0_i32, %c0_i32_0 : i32, i32
  }
  func.func @transform_6(%arg0: i32) -> (i32, i32) {
    %c0_i32 = arith.constant 0 : i32
    %c0_i32_0 = arith.constant 0 : i32
    %c0_i32_1 = arith.constant 0 : i32
    return %c0_i32, %c0_i32_0 : i32, i32
  }
  func.func @transform_7(%arg0: i32) -> (i32, i32) {
    %c0_i32 = arith.constant 0 : i32
    %c0_i32_0 = arith.constant 0 : i32
    return %arg0, %c0_i32 : i32, i32
  }
  func.func @transform_8(%arg0: i32) -> (i32, i32) {
    %c0_i32 = arith.constant 0 : i32
    %c0_i32_0 = arith.constant 0 : i32
    return %arg0, %c0_i32 : i32, i32
  }
}

</mosaic_0001>

<bundles_post_ra>
// kernel: tpu_custom_call.1
= control target key start
LH: loop header
LB: loop body
LE: loop exit
PB: predicated region body
PF: predicated region fallthrough
CT: control target
= control target key end

     0   :  { %14 = vsyncpa [#allocation3], 0  ;;  %s902_s0 = inlined_call_operand.hbm [shape: bf16[16,32], index: 0, kind: input, shape index: {}]   ;;  %s903_s1 = inlined_call_operand.hbm [shape: bf16[32,128], index: 1, kind: input, shape index: {}]   ;;  %s904_s2 = inlined_call_operand.vmem [shape: f32[1,128], index: 2, kind: input, shape index: {}]   ;;  %s905_s3 = inlined_call_operand.hbm [shape: bf16[128,128], index: 3, kind: input, shape index: {}]   ;;  %s906_s4 = inlined_call_operand.vmem [shape: f32[1,128], index: 4, kind: input, shape index: {}]   ;;  %s907_s5 = inlined_call_operand.hbm [shape: bf16[128,128], index: 5, kind: input, shape index: {}]   ;;  %s908_s6 = inlined_call_operand.vmem [shape: f32[1,128], index: 6, kind: input, shape index: {}]   ;;  %s909_s7 = inlined_call_operand.hbm [shape: f32[16,128], index: 7, kind: output, shape index: {0}]   ;;  %s910_s8 = inlined_call_operand.hbm [shape: bf16[16,128], index: 8, kind: output, shape index: {1}]  }
   0x1   :  { %15 = vsyncpa [#allocation6], 0 }
   0x2   :  { %16 = vsyncpa [#allocation9], 0 }
   0x3   :  { %17 = vsyncpa [#allocation4], 0 }
   0x4   :  { %18 = vsyncpa [#allocation12], 0  ;;  %s711_s27 = smov [#allocation5]   ;;  %s712_s29 = smov [#allocation2]  }
   0x5   :  { %s36_s28 = sshll.u32 %s711_s27, 4  ;;  %s24_s30 = sshll.u32 %s712_s29, 4  ;;  %s37_s28 = int_to_ptr.vmem [resolvable:$true] %s36_s28  ;;  %s768_s30 = int_to_ptr.vmem [resolvable:$true] %s24_s30 }
   0x6   :  { %s569_s11 = scalar_lea.hbm %s903_s1, 256 }
   0x7   :  { %p570_p0 = scmp.ne.s32.totalorder %s903_s1, %s569_s11  ;;  %p573_p1 = scmp.lt.u32.totalorder %s569_s11, %s903_s1 }
   0x9   :  { %p575_p2 = pnand %p573_p1, %p570_p0 }
   0xb   :  { %578 = shalt.err (!%p575_p2)
}
   0xc   :  { %s579_s16 = scalar_lea.vmem %s37_s28, 256  ;;  %p584_p4 = scmp.lt.s32.totalorder %s37_s28, %s37_s28 }
   0xd   :  { %p580_p3 = scmp.ne.s32.totalorder %s37_s28, %s579_s16  ;;  %p585_p5 = scmp.lt.s32.totalorder %s579_s16, %s579_s16 }
   0xf   :  { %p586_p6 = por %p585_p5, %p584_p4 }
  0x11   :  { %p587_p7 = pnand %p586_p6, %p580_p3 }
  0x13   :  { %590 = shalt.err (!%p587_p7)
}
  0x14   :  { %s713_s17 = smov 64   ;;  %s714_s18 = smov 4  }
  0x15   :  { %42 = dma.hbm_to_vmem [thread:$0]  %s903_s1, 256, %s37_s28, [#allocation6], %s713_s17, %s713_s17, %s714_s18  }
  0x16   :  { %s591_s23 = scalar_lea.hbm %s902_s0, 128 }
  0x17   :  { %p592_p8 = scmp.ne.s32.totalorder %s902_s0, %s591_s23  ;;  %p595_p9 = scmp.lt.u32.totalorder %s591_s23, %s902_s0 }
  0x19   :  { %p597_p10 = pnand %p595_p9, %p592_p8 }
  0x1b   :  { %600 = shalt.err (!%p597_p10)
}
  0x1c   :  { %s601_s29 = scalar_lea.vmem %s768_s30, 128  ;;  %p606_p12 = scmp.lt.s32.totalorder %s768_s30, %s768_s30 }
  0x1d   :  { %p602_p11 = scmp.ne.s32.totalorder %s768_s30, %s601_s29  ;;  %p607_p13 = scmp.lt.s32.totalorder %s601_s29, %s601_s29 }
  0x1f   :  { %p608_p0 = por %p607_p13, %p606_p12 }
  0x21   :  { %p609_p1 = pnand %p608_p0, %p602_p11 }
  0x23   :  { %612 = shalt.err (!%p609_p1)
}
  0x24   :  { %30 = dma.hbm_to_vmem [thread:$0]  %s902_s0, 128, %s768_s30, [#allocation3], %s713_s17, %s713_s17, %s714_s18  }
  0x25   :  { %s715_s9 = smov [#allocation7]   ;;  %s716_s11 = smov [#allocation8]  }
  0x26   :  { %s50_s10 = sshll.u32 %s715_s9, 4  ;;  %s64_s12 = sshll.u32 %s716_s11, 4  ;;  %s51_s10 = int_to_ptr.vmem [resolvable:$true] %s50_s10  ;;  %s805_s12 = int_to_ptr.vmem [resolvable:$true] %s64_s12 }
  0x27   :  { %s613_s15 = scalar_lea.hbm %s905_s3, 1024 }
  0x28   :  { %p614_p2 = scmp.ne.s32.totalorder %s905_s3, %s613_s15  ;;  %p617_p3 = scmp.lt.u32.totalorder %s613_s15, %s905_s3 }
  0x2a   :  { %p619_p4 = pnand %p617_p3, %p614_p2 }
  0x2c   :  { %622 = shalt.err (!%p619_p4)
}
  0x2d   :  { %s623_s0 = scalar_lea.vmem %s51_s10, 1024  ;;  %p628_p6 = scmp.lt.s32.totalorder %s51_s10, %s51_s10 }
  0x2e   :  { %p624_p5 = scmp.ne.s32.totalorder %s51_s10, %s623_s0  ;;  %p629_p7 = scmp.lt.s32.totalorder %s623_s0, %s623_s0 }
  0x30   :  { %p630_p8 = por %p629_p7, %p628_p6 }
  0x32   :  { %p631_p9 = pnand %p630_p8, %p624_p5 }
  0x34   :  { %634 = shalt.err (!%p631_p9)
}
  0x35   :  { %56 = dma.hbm_to_vmem [thread:$0]  %s905_s3, 1024, %s51_s10, [#allocation6], %s713_s17, %s713_s17, %s714_s18  }
  0x36   :  { %s635_s25 = scalar_lea.hbm %s907_s5, 1024 }
  0x37   :  { %p636_p10 = scmp.ne.s32.totalorder %s907_s5, %s635_s25  ;;  %p639_p11 = scmp.lt.u32.totalorder %s635_s25, %s907_s5 }
  0x39   :  { %p641_p12 = pnand %p639_p11, %p636_p10 }
  0x3b   :  { %644 = shalt.err (!%p641_p12)
}
  0x3c   :  { %s645_s28 = scalar_lea.vmem %s805_s12, 1024  ;;  %p650_p0 = scmp.lt.s32.totalorder %s805_s12, %s805_s12 }
  0x3d   :  { %p646_p13 = scmp.ne.s32.totalorder %s805_s12, %s645_s28  ;;  %p651_p1 = scmp.lt.s32.totalorder %s645_s28, %s645_s28 }
  0x3f   :  { %p652_p2 = por %p651_p1, %p650_p0 }
  0x41   :  { %p653_p3 = pnand %p652_p2, %p646_p13 }
  0x43   :  { %656 = shalt.err (!%p653_p3)
}
  0x44   :  { %70 = dma.hbm_to_vmem [thread:$0]  %s907_s5, 1024, %s805_s12, [#allocation9], %s713_s17, %s713_s17, %s714_s18  }
  0x45   :  { %701 = dma.done.wait [#allocation3], 128  }
  0x46   :  { %702 = vsyncadd [#allocation3], 4294967168 }
  0x47   :  { %703 = dma.done.wait [#allocation6], 1280  }
  0x48   :  { %704 = vsyncadd [#allocation6], 4294966016 }
  0x49   :  { %705 = dma.done.wait [#allocation9], 1024  }
  0x4a   :  { %706 = vsyncadd [#allocation9], 4294966272  ;;  %v717_v0 = vmov 0.0   ;;  %vm718_vm0 = vmmov 0   ;;  %v550_v1 = vld [vmem:[#allocation5] sm:$0xff]   ;;  %v551_v2 = vld [vmem:[#allocation5 + $0x8] sm:$0xff]  }
  0x4b   :  { %490 = vmatprep.subr.bf16.mxu0 %v717_v0  ;;  %494 = vmatprep.mubr.msk.bf16.mxu0 %vm718_vm0, %v717_v0  ;;  %v553_v3 = vld [vmem:[#allocation7] sm:$0xff]   ;;  %v552_v4 = vld [vmem:[#allocation2] sm:$0xff]   ;;  %vm116_vm1 = vcmask 261120   ;;  %v555_v6 = vld [vmem:[#allocation7 + $0x10] sm:$0xff]  }
  0x4c   :  { %498 = vmatprep.subr.bf16.mxu1 %v717_v0  ;;  %514 = vmatprep.mubr.msk.bf16.mxu1 %vm718_vm0, %v717_v0  ;;  %v554_v5 = vld [vmem:[#allocation7 + $0x8] sm:$0xff]   ;;  %v556_v7 = vld [vmem:[#allocation7 + $0x18] sm:$0xff]   ;;  %v557_v8 = vld [vmem:[#allocation7 + $0x20] sm:$0xff]  }
  0x4d   :  { %491 = vmatpush3.bf16.msra.mxu0 %v550_v1  ;;  %499 = vmatpush3.bf16.msra.mxu1 %v553_v3  ;;  %v558_v9 = vld [vmem:[#allocation7 + $0x28] sm:$0xff]   ;;  %v559_v10 = vld [vmem:[#allocation7 + $0x30] sm:$0xff]   ;;  %v560_v11 = vld [vmem:[#allocation7 + $0x38] sm:$0xff]  }
  0x4e   :  { %492 = vmatprep.subr.bf16.mxu0 %v717_v0  ;;  %500 = vmatprep.subr.bf16.mxu1 %v717_v0  ;;  %v561_v12 = vld [vmem:[#allocation8] sm:$0xff]   ;;  %v562_v13 = vld [vmem:[#allocation8 + $0x8] sm:$0xff]   ;;  %v563_v14 = vld [vmem:[#allocation8 + $0x10] sm:$0xff]  }
  0x4f   :  { %v564_v15 = vld [vmem:[#allocation8 + $0x18] sm:$0xff]   ;;  %v565_v16 = vld [vmem:[#allocation8 + $0x20] sm:$0xff]   ;;  %v566_v17 = vld [vmem:[#allocation8 + $0x28] sm:$0xff]  }
  0x50   :  { %v437_v18 = vld [vmem:[%s904_s2] ss:$0 sm:$0xff]  ;;  %v567_v28 = vld [vmem:[#allocation8 + $0x30] sm:$0xff]   ;;  %v568_v29 = vld [vmem:[#allocation8 + $0x38] sm:$0xff]   ;;  %s719_s2 = smov [#allocation11]  }
  0x51   :  { %493 = vmatpush3.bf16.msra.mxu0 %v551_v2  ;;  %501 = vmatpush3.bf16.msra.mxu1 %v554_v5  ;;  %v444_v30 = vld [vmem:[%s906_s4] ss:$0 sm:$0xff]  ;;  %s419_s13 = sshll.u32 %s719_s2, 4  ;;  %s420_s13 = int_to_ptr.vmem [resolvable:$true] %s419_s13 }
  0x52   :  { %518 = vmatprep.subr.bf16.mxu0 %v717_v0  ;;  %502 = vmatprep.subr.bf16.mxu1 %v717_v0  ;;  %s657_s14 = scalar_lea.vmem %s420_s13, 128  ;;  %p662_p5 = scmp.lt.s32.totalorder %s420_s13, %s420_s13 }
  0x53   :  { %p658_p4 = scmp.ne.s32.totalorder %s420_s13, %s657_s14  ;;  %p663_p6 = scmp.lt.s32.totalorder %s657_s14, %s657_s14 }
  0x54   :  { %495 = vmatmul.mubr.msk.bf16.vlgmr.msra.gmra.mrb[0].mxu0 %vm116_vm1, %v552_v4 }
  0x55   :  { %534 = vmatprep.mubr.msk.bf16.mxu0 %vm718_vm0, %v717_v0  ;;  %503 = vmatpush3.bf16.msra.mxu1 %v555_v6  ;;  %p664_p7 = por %p663_p6, %p662_p5 }
  0x56   :  { %504 = vmatprep.subr.bf16.mxu1 %v717_v0  ;;  %519 = vmatpush3.bf16.msra.mxu0 %v561_v12 }
  0x57   :  { %520 = vmatprep.subr.bf16.mxu0 %v717_v0  ;;  %p665_p8 = pnand %p664_p7, %p658_p4 }
  0x59   :  { %505 = vmatpush3.bf16.msra.mxu1 %v556_v7 }
  0x5a   :  { %506 = vmatprep.subr.bf16.mxu1 %v717_v0  ;;  %521 = vmatpush3.bf16.msra.mxu0 %v562_v13 }
  0x5b   :  { %522 = vmatprep.subr.bf16.mxu0 %v717_v0 }
  0x5d   :  { %507 = vmatpush3.bf16.msra.mxu1 %v557_v8 }
  0x5e   :  { %508 = vmatprep.subr.bf16.mxu1 %v717_v0  ;;  %523 = vmatpush3.bf16.msra.mxu0 %v563_v14 }
  0x5f   :  { %524 = vmatprep.subr.bf16.mxu0 %v717_v0 }
  0x61   :  { %509 = vmatpush3.bf16.msra.mxu1 %v558_v9 }
  0x62   :  { %510 = vmatprep.subr.bf16.mxu1 %v717_v0  ;;  %525 = vmatpush3.bf16.msra.mxu0 %v564_v15 }
  0x63   :  { %526 = vmatprep.subr.bf16.mxu0 %v717_v0 }
  0x65   :  { %511 = vmatpush3.bf16.msra.mxu1 %v559_v10 }
  0x66   :  { %512 = vmatprep.subr.bf16.mxu1 %v717_v0  ;;  %527 = vmatpush3.bf16.msra.mxu0 %v565_v16 }
  0x67   :  { %528 = vmatprep.subr.bf16.mxu0 %v717_v0 }
  0x69   :  { %513 = vmatpush3.bf16.msra.mxu1 %v560_v11 }
  0x6a   :  { %529 = vmatpush3.bf16.msra.mxu0 %v566_v17 }
  0x6b   :  { %530 = vmatprep.subr.bf16.mxu0 %v717_v0 }
  0x6e   :  { %531 = vmatpush3.bf16.msra.mxu0 %v567_v28 }
  0x6f   :  { %532 = vmatprep.subr.bf16.mxu0 %v717_v0 }
  0x72   :  { %533 = vmatpush3.bf16.msra.mxu0 %v568_v29 }
 0x127   :  { %v154_v19 = vpop.f32.mrb[0].mxu0 }
 0x128   :  { %v155_v20 = vadd.f32 %v437_v18, %v154_v19  ;;  %v496_v21 = vpop.f32.mrb[1].mxu0 }
 0x129   :  { %v157_v22 = vpop.f32.mrb[2].mxu0 }
 0x12a   :  { %v158_v23 = vadd.f32 %v437_v18, %v157_v22  ;;  %v497_v24 = vpop.f32.mrb[3].mxu0  ;;  %v161_v25 = vmax.f32 %v155_v20, 0.0 }
 0x12c   :  { %v162_v26 = vmax.f32 %v158_v23, 0.0 }
 0x12e   :  { %v163_v27 = vpack.c.bf16 %v162_v26, %v161_v25 }
 0x130   :  { %468 = vst [vmem:[#allocation11] sm:$0xff] %v163_v27   ;;  %515 = vmatmul.mubr.bf16.vlgmr.msra.gmra.mrb[0].mxu1 %v163_v27 }
 0x203   :  { %v278_v31 = vpop.f32.mrb[0].mxu1 }
 0x204   :  { %v279_v32 = vadd.f32 %v444_v30, %v278_v31  ;;  %v516_v33 = vpop.f32.mrb[1].mxu1 }
 0x205   :  { %v281_v34 = vpop.f32.mrb[2].mxu1 }
 0x206   :  { %v282_v35 = vadd.f32 %v444_v30, %v281_v34  ;;  %v517_v36 = vpop.f32.mrb[3].mxu1  ;;  %v285_v37 = vmax.f32 %v279_v32, 0.0 }
 0x208   :  { %v286_v38 = vmax.f32 %v282_v35, 0.0 }
 0x20a   :  { %v287_v39 = vpack.c.bf16 %v286_v38, %v285_v37 }
 0x20c   :  { %535 = vmatmul.mubr.bf16.vlgmr.msra.gmra.mrb[4].mxu0 %v287_v39 }
 0x20d   :  { %668 = shalt.err (!%p665_p8)
}
 0x20e   :  { %s669_s16 = scalar_lea.hbm %s910_s8, 128 }
 0x20f   :  { %p670_p9 = scmp.ne.s32.totalorder %s910_s8, %s669_s16  ;;  %p673_p10 = scmp.lt.u32.totalorder %s669_s16, %s910_s8 }
 0x211   :  { %p675_p11 = pnand %p673_p10, %p670_p9 }
 0x213   :  { %678 = shalt.err (!%p675_p11)
}
 0x214   :  { %425 = dma.vmem_to_hbm [thread:$0]  %s420_s13, 128, %s910_s8, [#allocation12], %s713_s17, %s713_s17, %s714_s18  }
 0x215   :  { %v453_v40 = vld [vmem:[%s908_s6] ss:$0 sm:$0xff]  ;;  %s720_s25 = smov [#allocation10]  }
 0x216   :  { %s407_s26 = sshll.u32 %s720_s25, 4  ;;  %s408_s26 = int_to_ptr.vmem [resolvable:$true] %s407_s26 }
 0x217   :  { %s679_s27 = scalar_lea.vmem %s408_s26, 256  ;;  %p684_p13 = scmp.lt.s32.totalorder %s408_s26, %s408_s26 }
 0x218   :  { %p680_p12 = scmp.ne.s32.totalorder %s408_s26, %s679_s27  ;;  %p685_p0 = scmp.lt.s32.totalorder %s679_s27, %s679_s27 }
 0x21a   :  { %p686_p1 = por %p685_p0, %p684_p13 }
 0x21c   :  { %p687_p2 = pnand %p686_p1, %p680_p12 }
 0x2df   :  { %v393_v41 = vpop.f32.mrb[4].mxu0 }
 0x2e0   :  { %v394_v42 = vadd.f32 %v453_v40, %v393_v41  ;;  %v536_v43 = vpop.f32.mrb[5].mxu0 }
 0x2e1   :  { %v396_v44 = vpop.f32.mrb[6].mxu0 }
 0x2e2   :  { %400 = vst [vmem:[#allocation10] sm:$0xff] %v394_v42  ;;  %v397_v45 = vadd.f32 %v453_v40, %v396_v44  ;;  %v537_v46 = vpop.f32.mrb[7].mxu0 }
 0x2e4   :  { %401 = vst [vmem:[#allocation10 + $0x8] sm:$0xff] %v397_v45 }
 0x2e5   :  { %690 = shalt.err (!%p687_p2)
}
 0x2e6   :  { %s691_s17 = scalar_lea.hbm %s909_s7, 256 }
 0x2e7   :  { %p692_p3 = scmp.ne.s32.totalorder %s909_s7, %s691_s17  ;;  %p695_p4 = scmp.lt.u32.totalorder %s691_s17, %s909_s7 }
 0x2e9   :  { %p697_p5 = pnand %p695_p4, %p692_p3 }
 0x2eb   :  { %700 = shalt.err (!%p697_p5)
}
 0x2ec   :  { %s721_s3 = smov 128   ;;  %s722_s9 = smov 8  }
 0x2ed   :  { %413 = dma.vmem_to_hbm [thread:$0]  %s408_s26, 256, %s909_s7, [#allocation4], %s721_s3, %s721_s3, %s722_s9  }
 0x2ee   :  { %707 = dma.done.wait [#allocation4], 256  }
 0x2ef   :  { %708 = vsyncadd [#allocation4], 4294967040 }
 0x2f0   :  { %709 = dma.done.wait [#allocation12], 128  }
 0x2f1   :  { %710 = vsyncadd [#allocation12], 4294967168 }
 0x2f2   :  { %432 = vsyncpa [#allocation3], 1 }
 0x2f3   :  { %433 = vsyncpa [#allocation6], 1 }
 0x2f4   :  { %434 = vsyncpa [#allocation9], 1 }
 0x2f5   :  { %435 = vsyncpa [#allocation4], 1 }
 0x2f6   :  { %436 = vsyncpa [#allocation12], 1 }

// kernel: tpu_custom_call.1
= control target key start
LH: loop header
LB: loop body
LE: loop exit
PB: predicated region body
PF: predicated region fallthrough
CT: control target
= control target key end

     0   :  { %14 = vsyncpa [#allocation3], 0  ;;  %s902_s0 = inlined_call_operand.hbm [shape: bf16[16,32], index: 0, kind: input, shape index: {}]   ;;  %s903_s1 = inlined_call_operand.hbm [shape: bf16[32,128], index: 1, kind: input, shape index: {}]   ;;  %s904_s2 = inlined_call_operand.vmem [shape: f32[1,128], index: 2, kind: input, shape index: {}]   ;;  %s905_s3 = inlined_call_operand.hbm [shape: bf16[128,128], index: 3, kind: input, shape index: {}]   ;;  %s906_s4 = inlined_call_operand.vmem [shape: f32[1,128], index: 4, kind: input, shape index: {}]   ;;  %s907_s5 = inlined_call_operand.hbm [shape: bf16[128,128], index: 5, kind: input, shape index: {}]   ;;  %s908_s6 = inlined_call_operand.vmem [shape: f32[1,128], index: 6, kind: input, shape index: {}]   ;;  %s909_s7 = inlined_call_operand.hbm [shape: f32[16,128], index: 7, kind: output, shape index: {0}]   ;;  %s910_s8 = inlined_call_operand.hbm [shape: bf16[16,128], index: 8, kind: output, shape index: {1}]  }
   0x1   :  { %15 = vsyncpa [#allocation6], 0 }
   0x2   :  { %16 = vsyncpa [#allocation9], 0 }
   0x3   :  { %17 = vsyncpa [#allocation4], 0 }
   0x4   :  { %18 = vsyncpa [#allocation12], 0  ;;  %s711_s27 = smov [#allocation5]   ;;  %s712_s29 = smov [#allocation2]  }
   0x5   :  { %s36_s28 = sshll.u32 %s711_s27, 4  ;;  %s24_s30 = sshll.u32 %s712_s29, 4  ;;  %s37_s28 = int_to_ptr.vmem [resolvable:$true] %s36_s28  ;;  %s768_s30 = int_to_ptr.vmem [resolvable:$true] %s24_s30 }
   0x6   :  { %s569_s11 = scalar_lea.hbm %s903_s1, 256 }
   0x7   :  { %p570_p0 = scmp.ne.s32.totalorder %s903_s1, %s569_s11  ;;  %p573_p1 = scmp.lt.u32.totalorder %s569_s11, %s903_s1 }
   0x9   :  { %p575_p2 = pnand %p573_p1, %p570_p0 }
   0xb   :  { %578 = shalt.err (!%p575_p2)
}
   0xc   :  { %s579_s16 = scalar_lea.vmem %s37_s28, 256  ;;  %p584_p4 = scmp.lt.s32.totalorder %s37_s28, %s37_s28 }
   0xd   :  { %p580_p3 = scmp.ne.s32.totalorder %s37_s28, %s579_s16  ;;  %p585_p5 = scmp.lt.s32.totalorder %s579_s16, %s579_s16 }
   0xf   :  { %p586_p6 = por %p585_p5, %p584_p4 }
  0x11   :  { %p587_p7 = pnand %p586_p6, %p580_p3 }
  0x13   :  { %590 = shalt.err (!%p587_p7)
}
  0x14   :  { %s713_s17 = smov 64   ;;  %s714_s18 = smov 4  }
  0x15   :  { %42 = dma.hbm_to_vmem [thread:$0]  %s903_s1, 256, %s37_s28, [#allocation6], %s713_s17, %s713_s17, %s714_s18  }
  0x16   :  { %s591_s23 = scalar_lea.hbm %s902_s0, 128 }
  0x17   :  { %p592_p8 = scmp.ne.s32.totalorder %s902_s0, %s591_s23  ;;  %p595_p9 = scmp.lt.u32.totalorder %s591_s23, %s902_s0 }
  0x19   :  { %p597_p10 = pnand %p595_p9, %p592_p8 }
  0x1b   :  { %600 = shalt.err (!%p597_p10)
}
  0x1c   :  { %s601_s29 = scalar_lea.vmem %s768_s30, 128  ;;  %p606_p12 = scmp.lt.s32.totalorder %s768_s30, %s768_s30 }
  0x1d   :  { %p602_p11 = scmp.ne.s32.totalorder %s768_s30, %s601_s29  ;;  %p607_p13 = scmp.lt.s32.totalorder %s601_s29, %s601_s29 }
  0x1f   :  { %p608_p0 = por %p607_p13, %p606_p12 }
  0x21   :  { %p609_p1 = pnand %p608_p0, %p602_p11 }
  0x23   :  { %612 = shalt.err (!%p609_p1)
}
  0x24   :  { %30 = dma.hbm_to_vmem [thread:$0]  %s902_s0, 128, %s768_s30, [#allocation3], %s713_s17, %s713_s17, %s714_s18  }
  0x25   :  { %s715_s9 = smov [#allocation7]   ;;  %s716_s11 = smov [#allocation8]  }
  0x26   :  { %s50_s10 = sshll.u32 %s715_s9, 4  ;;  %s64_s12 = sshll.u32 %s716_s11, 4  ;;  %s51_s10 = int_to_ptr.vmem [resolvable:$true] %s50_s10  ;;  %s805_s12 = int_to_ptr.vmem [resolvable:$true] %s64_s12 }
  0x27   :  { %s613_s15 = scalar_lea.hbm %s905_s3, 1024 }
  0x28   :  { %p614_p2 = scmp.ne.s32.totalorder %s905_s3, %s613_s15  ;;  %p617_p3 = scmp.lt.u32.totalorder %s613_s15, %s905_s3 }
  0x2a   :  { %p619_p4 = pnand %p617_p3, %p614_p2 }
  0x2c   :  { %622 = shalt.err (!%p619_p4)
}
  0x2d   :  { %s623_s0 = scalar_lea.vmem %s51_s10, 1024  ;;  %p628_p6 = scmp.lt.s32.totalorder %s51_s10, %s51_s10 }
  0x2e   :  { %p624_p5 = scmp.ne.s32.totalorder %s51_s10, %s623_s0  ;;  %p629_p7 = scmp.lt.s32.totalorder %s623_s0, %s623_s0 }
  0x30   :  { %p630_p8 = por %p629_p7, %p628_p6 }
  0x32   :  { %p631_p9 = pnand %p630_p8, %p624_p5 }
  0x34   :  { %634 = shalt.err (!%p631_p9)
}
  0x35   :  { %56 = dma.hbm_to_vmem [thread:$0]  %s905_s3, 1024, %s51_s10, [#allocation6], %s713_s17, %s713_s17, %s714_s18  }
  0x36   :  { %s635_s25 = scalar_lea.hbm %s907_s5, 1024 }
  0x37   :  { %p636_p10 = scmp.ne.s32.totalorder %s907_s5, %s635_s25  ;;  %p639_p11 = scmp.lt.u32.totalorder %s635_s25, %s907_s5 }
  0x39   :  { %p641_p12 = pnand %p639_p11, %p636_p10 }
  0x3b   :  { %644 = shalt.err (!%p641_p12)
}
  0x3c   :  { %s645_s28 = scalar_lea.vmem %s805_s12, 1024  ;;  %p650_p0 = scmp.lt.s32.totalorder %s805_s12, %s805_s12 }
  0x3d   :  { %p646_p13 = scmp.ne.s32.totalorder %s805_s12, %s645_s28  ;;  %p651_p1 = scmp.lt.s32.totalorder %s645_s28, %s645_s28 }
  0x3f   :  { %p652_p2 = por %p651_p1, %p650_p0 }
  0x41   :  { %p653_p3 = pnand %p652_p2, %p646_p13 }
  0x43   :  { %656 = shalt.err (!%p653_p3)
}
  0x44   :  { %70 = dma.hbm_to_vmem [thread:$0]  %s907_s5, 1024, %s805_s12, [#allocation9], %s713_s17, %s713_s17, %s714_s18  }
  0x45   :  { %701 = dma.done.wait [#allocation3], 128  }
  0x46   :  { %702 = vsyncadd [#allocation3], 4294967168 }
  0x47   :  { %703 = dma.done.wait [#allocation6], 1280  }
  0x48   :  { %704 = vsyncadd [#allocation6], 4294966016 }
  0x49   :  { %705 = dma.done.wait [#allocation9], 1024  }
  0x4a   :  { %706 = vsyncadd [#allocation9], 4294966272  ;;  %v717_v0 = vmov 0.0   ;;  %vm718_vm0 = vmmov 0   ;;  %v550_v1 = vld [vmem:[#allocation5] sm:$0xff]   ;;  %v551_v2 = vld [vmem:[#allocation5 + $0x8] sm:$0xff]  }
  0x4b   :  { %490 = vmatprep.subr.bf16.mxu0 %v717_v0  ;;  %494 = vmatprep.mubr.msk.bf16.mxu0 %vm718_vm0, %v717_v0  ;;  %v553_v3 = vld [vmem:[#allocation7] sm:$0xff]   ;;  %v552_v4 = vld [vmem:[#allocation2] sm:$0xff]   ;;  %vm116_vm1 = vcmask 261120   ;;  %v555_v6 = vld [vmem:[#allocation7 + $0x10] sm:$0xff]  }
  0x4c   :  { %498 = vmatprep.subr.bf16.mxu1 %v717_v0  ;;  %514 = vmatprep.mubr.msk.bf16.mxu1 %vm718_vm0, %v717_v0  ;;  %v554_v5 = vld [vmem:[#allocation7 + $0x8] sm:$0xff]   ;;  %v556_v7 = vld [vmem:[#allocation7 + $0x18] sm:$0xff]   ;;  %v557_v8 = vld [vmem:[#allocation7 + $0x20] sm:$0xff]  }
  0x4d   :  { %491 = vmatpush3.bf16.msra.mxu0 %v550_v1  ;;  %499 = vmatpush3.bf16.msra.mxu1 %v553_v3  ;;  %v558_v9 = vld [vmem:[#allocation7 + $0x28] sm:$0xff]   ;;  %v559_v10 = vld [vmem:[#allocation7 + $0x30] sm:$0xff]   ;;  %v560_v11 = vld [vmem:[#allocation7 + $0x38] sm:$0xff]  }
  0x4e   :  { %492 = vmatprep.subr.bf16.mxu0 %v717_v0  ;;  %500 = vmatprep.subr.bf16.mxu1 %v717_v0  ;;  %v561_v12 = vld [vmem:[#allocation8] sm:$0xff]   ;;  %v562_v13 = vld [vmem:[#allocation8 + $0x8] sm:$0xff]   ;;  %v563_v14 = vld [vmem:[#allocation8 + $0x10] sm:$0xff]  }
  0x4f   :  { %v564_v15 = vld [vmem:[#allocation8 + $0x18] sm:$0xff]   ;;  %v565_v16 = vld [vmem:[#allocation8 + $0x20] sm:$0xff]   ;;  %v566_v17 = vld [vmem:[#allocation8 + $0x28] sm:$0xff]  }
  0x50   :  { %v437_v18 = vld [vmem:[%s904_s2] ss:$0 sm:$0xff]  ;;  %v567_v28 = vld [vmem:[#allocation8 + $0x30] sm:$0xff]   ;;  %v568_v29 = vld [vmem:[#allocation8 + $0x38] sm:$0xff]   ;;  %s719_s2 = smov [#allocation11]  }
  0x51   :  { %493 = vmatpush3.bf16.msra.mxu0 %v551_v2  ;;  %501 = vmatpush3.bf16.msra.mxu1 %v554_v5  ;;  %v444_v30 = vld [vmem:[%s906_s4] ss:$0 sm:$0xff]  ;;  %s419_s13 = sshll.u32 %s719_s2, 4  ;;  %s420_s13 = int_to_ptr.vmem [resolvable:$true] %s419_s13 }
  0x52   :  { %518 = vmatprep.subr.bf16.mxu0 %v717_v0  ;;  %502 = vmatprep.subr.bf16.mxu1 %v717_v0  ;;  %s657_s14 = scalar_lea.vmem %s420_s13, 128  ;;  %p662_p5 = scmp.lt.s32.totalorder %s420_s13, %s420_s13 }
  0x53   :  { %p658_p4 = scmp.ne.s32.totalorder %s420_s13, %s657_s14  ;;  %p663_p6 = scmp.lt.s32.totalorder %s657_s14, %s657_s14 }
  0x54   :  { %495 = vmatmul.mubr.msk.bf16.vlgmr.msra.gmra.mrb[0].mxu0 %vm116_vm1, %v552_v4 }
  0x55   :  { %534 = vmatprep.mubr.msk.bf16.mxu0 %vm718_vm0, %v717_v0  ;;  %503 = vmatpush3.bf16.msra.mxu1 %v555_v6  ;;  %p664_p7 = por %p663_p6, %p662_p5 }
  0x56   :  { %504 = vmatprep.subr.bf16.mxu1 %v717_v0  ;;  %519 = vmatpush3.bf16.msra.mxu0 %v561_v12 }
  0x57   :  { %520 = vmatprep.subr.bf16.mxu0 %v717_v0  ;;  %p665_p8 = pnand %p664_p7, %p658_p4 }
  0x59   :  { %505 = vmatpush3.bf16.msra.mxu1 %v556_v7 }
  0x5a   :  { %506 = vmatprep.subr.bf16.mxu1 %v717_v0  ;;  %521 = vmatpush3.bf16.msra.mxu0 %v562_v13 }
  0x5b   :  { %522 = vmatprep.subr.bf16.mxu0 %v717_v0 }
  0x5d   :  { %507 = vmatpush3.bf16.msra.mxu1 %v557_v8 }
  0x5e   :  { %508 = vmatprep.subr.bf16.mxu1 %v717_v0  ;;  %523 = vmatpush3.bf16.msra.mxu0 %v563_v14 }
  0x5f   :  { %524 = vmatprep.subr.bf16.mxu0 %v717_v0 }
  0x61   :  { %509 = vmatpush3.bf16.msra.mxu1 %v558_v9 }
  0x62   :  { %510 = vmatprep.subr.bf16.mxu1 %v717_v0  ;;  %525 = vmatpush3.bf16.msra.mxu0 %v564_v15 }
  0x63   :  { %526 = vmatprep.subr.bf16.mxu0 %v717_v0 }
  0x65   :  { %511 = vmatpush3.bf16.msra.mxu1 %v559_v10 }
  0x66   :  { %512 = vmatprep.subr.bf16.mxu1 %v717_v0  ;;  %527 = vmatpush3.bf16.msra.mxu0 %v565_v16 }
  0x67   :  { %528 = vmatprep.subr.bf16.mxu0 %v717_v0 }
  0x69   :  { %513 = vmatpush3.bf16.msra.mxu1 %v560_v11 }
  0x6a   :  { %529 = vmatpush3.bf16.msra.mxu0 %v566_v17 }
  0x6b   :  { %530 = vmatprep.subr.bf16.mxu0 %v717_v0 }
  0x6e   :  { %531 = vmatpush3.bf16.msra.mxu0 %v567_v28 }
  0x6f   :  { %532 = vmatprep.subr.bf16.mxu0 %v717_v0 }
  0x72   :  { %533 = vmatpush3.bf16.msra.mxu0 %v568_v29 }
 0x127   :  { %v154_v19 = vpop.f32.mrb[0].mxu0 }
 0x128   :  { %v155_v20 = vadd.f32 %v437_v18, %v154_v19  ;;  %v496_v21 = vpop.f32.mrb[1].mxu0 }
 0x129   :  { %v157_v22 = vpop.f32.mrb[2].mxu0 }
 0x12a   :  { %v158_v23 = vadd.f32 %v437_v18, %v157_v22  ;;  %v497_v24 = vpop.f32.mrb[3].mxu0  ;;  %v161_v25 = vmax.f32 %v155_v20, 0.0 }
 0x12c   :  { %v162_v26 = vmax.f32 %v158_v23, 0.0 }
 0x12e   :  { %v163_v27 = vpack.c.bf16 %v162_v26, %v161_v25 }
 0x130   :  { %468 = vst [vmem:[#allocation11] sm:$0xff] %v163_v27   ;;  %515 = vmatmul.mubr.bf16.vlgmr.msra.gmra.mrb[0].mxu1 %v163_v27 }
 0x203   :  { %v278_v31 = vpop.f32.mrb[0].mxu1 }
 0x204   :  { %v279_v32 = vadd.f32 %v444_v30, %v278_v31  ;;  %v516_v33 = vpop.f32.mrb[1].mxu1 }
 0x205   :  { %v281_v34 = vpop.f32.mrb[2].mxu1 }
 0x206   :  { %v282_v35 = vadd.f32 %v444_v30, %v281_v34  ;;  %v517_v36 = vpop.f32.mrb[3].mxu1  ;;  %v285_v37 = vmax.f32 %v279_v32, 0.0 }
 0x208   :  { %v286_v38 = vmax.f32 %v282_v35, 0.0 }
 0x20a   :  { %v287_v39 = vpack.c.bf16 %v286_v38, %v285_v37 }
 0x20c   :  { %535 = vmatmul.mubr.bf16.vlgmr.msra.gmra.mrb[4].mxu0 %v287_v39 }
 0x20d   :  { %668 = shalt.err (!%p665_p8)
}
 0x20e   :  { %s669_s16 = scalar_lea.hbm %s910_s8, 128 }
 0x20f   :  { %p670_p9 = scmp.ne.s32.totalorder %s910_s8, %s669_s16  ;;  %p673_p10 = scmp.lt.u32.totalorder %s669_s16, %s910_s8 }
 0x211   :  { %p675_p11 = pnand %p673_p10, %p670_p9 }
 0x213   :  { %678 = shalt.err (!%p675_p11)
}
 0x214   :  { %425 = dma.vmem_to_hbm [thread:$0]  %s420_s13, 128, %s910_s8, [#allocation12], %s713_s17, %s713_s17, %s714_s18  }
 0x215   :  { %v453_v40 = vld [vmem:[%s908_s6] ss:$0 sm:$0xff]  ;;  %s720_s25 = smov [#allocation10]  }
 0x216   :  { %s407_s26 = sshll.u32 %s720_s25, 4  ;;  %s408_s26 = int_to_ptr.vmem [resolvable:$true] %s407_s26 }
 0x217   :  { %s679_s27 = scalar_lea.vmem %s408_s26, 256  ;;  %p684_p13 = scmp.lt.s32.totalorder %s408_s26, %s408_s26 }
 0x218   :  { %p680_p12 = scmp.ne.s32.totalorder %s408_s26, %s679_s27  ;;  %p685_p0 = scmp.lt.s32.totalorder %s679_s27, %s679_s27 }
 0x21a   :  { %p686_p1 = por %p685_p0, %p684_p13 }
 0x21c   :  { %p687_p2 = pnand %p686_p1, %p680_p12 }
 0x2df   :  { %v393_v41 = vpop.f32.mrb[4].mxu0 }
 0x2e0   :  { %v394_v42 = vadd.f32 %v453_v40, %v393_v41  ;;  %v536_v43 = vpop.f32.mrb[5].mxu0 }
 0x2e1   :  { %v396_v44 = vpop.f32.mrb[6].mxu0 }
 0x2e2   :  { %400 = vst [vmem:[#allocation10] sm:$0xff] %v394_v42  ;;  %v397_v45 = vadd.f32 %v453_v40, %v396_v44  ;;  %v537_v46 = vpop.f32.mrb[7].mxu0 }
 0x2e4   :  { %401 = vst [vmem:[#allocation10 + $0x8] sm:$0xff] %v397_v45 }
 0x2e5   :  { %690 = shalt.err (!%p687_p2)
}
 0x2e6   :  { %s691_s17 = scalar_lea.hbm %s909_s7, 256 }
 0x2e7   :  { %p692_p3 = scmp.ne.s32.totalorder %s909_s7, %s691_s17  ;;  %p695_p4 = scmp.lt.u32.totalorder %s691_s17, %s909_s7 }
 0x2e9   :  { %p697_p5 = pnand %p695_p4, %p692_p3 }
 0x2eb   :  { %700 = shalt.err (!%p697_p5)
}
 0x2ec   :  { %s721_s3 = smov 128   ;;  %s722_s9 = smov 8  }
 0x2ed   :  { %413 = dma.vmem_to_hbm [thread:$0]  %s408_s26, 256, %s909_s7, [#allocation4], %s721_s3, %s721_s3, %s722_s9  }
 0x2ee   :  { %707 = dma.done.wait [#allocation4], 256  }
 0x2ef   :  { %708 = vsyncadd [#allocation4], 4294967040 }
 0x2f0   :  { %709 = dma.done.wait [#allocation12], 128  }
 0x2f1   :  { %710 = vsyncadd [#allocation12], 4294967168 }
 0x2f2   :  { %432 = vsyncpa [#allocation3], 1 }
 0x2f3   :  { %433 = vsyncpa [#allocation6], 1 }
 0x2f4   :  { %434 = vsyncpa [#allocation9], 1 }
 0x2f5   :  { %435 = vsyncpa [#allocation4], 1 }
 0x2f6   :  { %436 = vsyncpa [#allocation12], 1 }

</bundles_post_ra>
